<compile_context>
chip_gen: v7x
topology: tpu7x:2x2x1
jax: 0.10.0
libtpu: 0.0.40
codegen_flags: <defaults>
</compile_context>

<pallas_src>
import functools
import math

import jax
import jax.numpy as jnp
from jax import lax
from jax.experimental import pallas as pl
from jax.experimental.pallas import tpu as pltpu


def _round_up(v: int, m: int) -> int:
    return (v + m - 1) // m * m


# --------------------------------------------------------------------------
# Kernel 1: xw = x @ W_enc   (tiled over node rows)
# --------------------------------------------------------------------------
def _xw_kernel(x_ref, w_enc_ref, xw_ref):
    xw_ref[...] = jnp.dot(
        x_ref[...], w_enc_ref[...], preferred_element_type=jnp.float32
    )


# --------------------------------------------------------------------------
# Kernel 2: per adj-row tile:
#   emb = relu(adj_tile @ xw + b_enc)          (bf16 MXU operands, f32 accum)
#   st  = emb @ [w_src | w_dst]                -> (tile_n, 2) node scores
# --------------------------------------------------------------------------
def _encoder_scores_kernel(adj_ref, xw_ref, b_enc_ref, w_st_ref, st_ref):
    h = jnp.dot(
        adj_ref[...],                       # bf16 (exact 0/1)
        xw_ref[...].astype(jnp.bfloat16),   # bf16 operand, f32 accumulation
        preferred_element_type=jnp.float32,
    )
    emb = jnp.maximum(h + b_enc_ref[...], 0.0)              # f32 elementwise
    st_ref[...] = jnp.dot(emb, w_st_ref[...], preferred_element_type=jnp.float32)


# --------------------------------------------------------------------------
# Kernel 3: edge logits, lane-dense output (1, E_tile).
#   grid = (E_tiles, N_tiles); N is the reduction axis (output block resident).
#   logit_e = s[src_e] + t[dst_e] + b_edge
# --------------------------------------------------------------------------
def _edge_logit_kernel(src_ref, dst_ref, st_ref, b_edge_ref, out_ref):
    n_blk = st_ref.shape[0]
    te = out_ref.shape[1]

    @pl.when(pl.program_id(1) == 0)
    def _():
        out_ref[...] = jnp.full((1, te), b_edge_ref[0, 0], dtype=jnp.float32)

    n_off = pl.program_id(1) * n_blk
    node_ids = lax.broadcasted_iota(jnp.int32, (n_blk, te), 0) + n_off
    s_col = st_ref[:, 0:1]                                   # (n_blk, 1)
    t_col = st_ref[:, 1:2]                                   # (n_blk, 1)
    contrib = jnp.where(node_ids == src_ref[...], s_col, 0.0) + jnp.where(
        node_ids == dst_ref[...], t_col, 0.0
    )                                                        # (n_blk, te)
    out_ref[...] += jnp.sum(contrib, axis=0, keepdims=True)  # (1, te)


# --------------------------------------------------------------------------
# Wrapper
# --------------------------------------------------------------------------
@jax.jit
def view_learner_forward(x, adj, edge_index, params):
    n_nodes, feat_dim = x.shape
    emb_dim = params["w_enc"].shape[1]
    n_edges = edge_index.shape[1]

    # --- tile sizes (sized for v7x: keep per-step blocks well under 32 MiB) ---
    tile_n = 256 if n_nodes >= 256 else _round_up(max(n_nodes, 8), 8)
    n_pad = _round_up(n_nodes, tile_n)
    n_tiles = n_pad // tile_n

    tile_e = 512 if n_edges >= 512 else _round_up(max(n_edges, 128), 128)
    e_pad = _round_up(n_edges, tile_e)
    e_tiles = e_pad // tile_e

    # --- padded / lane-friendly inputs ---
    xf = jnp.zeros((n_pad, feat_dim), jnp.float32).at[:n_nodes].set(
        x.astype(jnp.float32)
    )
    adj_bf16 = jnp.zeros((n_pad, n_pad), jnp.bfloat16).at[:n_nodes, :n_nodes].set(
        adj.astype(jnp.bfloat16)                 # exact for 0/1, halves DMA/VMEM
    )
    src = jnp.full((1, e_pad), -1, jnp.int32).at[0, :n_edges].set(
        edge_index[0].astype(jnp.int32)          # -1 sentinel never matches a node id
    )
    dst = jnp.full((1, e_pad), -1, jnp.int32).at[0, :n_edges].set(
        edge_index[1].astype(jnp.int32)
    )
    w_enc = params["w_enc"].astype(jnp.float32)
    b_enc = params["b_enc"].astype(jnp.float32)                       # (1, D)
    w_st = jnp.concatenate(
        [params["w_edge"][:emb_dim], params["w_edge"][emb_dim:]], axis=1
    ).astype(jnp.float32)                                             # (D, 2)
    b_edge = params["b_edge"].astype(jnp.float32)                     # (1, 1)

    parallel = pltpu.CompilerParams(dimension_semantics=("parallel",))

    # --- K1: xw = x @ W_enc ---
    xw = pl.pallas_call(
        _xw_kernel,
        grid=(n_tiles,),
        in_specs=[
            pl.BlockSpec((tile_n, feat_dim), lambda i: (i, 0)),
            pl.BlockSpec((feat_dim, emb_dim), lambda i: (0, 0)),
        ],
        out_specs=pl.BlockSpec((tile_n, emb_dim), lambda i: (i, 0)),
        out_shape=jax.ShapeDtypeStruct((n_pad, emb_dim), jnp.float32),
        compiler_params=parallel,
    )(xf, w_enc)

    # --- K2: node scores st[:, 0] = emb @ w_src, st[:, 1] = emb @ w_dst ---
    # TODO(synk): for very large N also tile adj along its column/reduction axis.
    st = pl.pallas_call(
        _encoder_scores_kernel,
        grid=(n_tiles,),
        in_specs=[
            pl.BlockSpec((tile_n, n_pad), lambda i: (i, 0)),     # adj row tile (bf16)
            pl.BlockSpec((n_pad, emb_dim), lambda i: (0, 0)),    # full xw
            pl.BlockSpec((1, emb_dim), lambda i: (0, 0)),        # b_enc
            pl.BlockSpec((emb_dim, 2), lambda i: (0, 0)),        # [w_src | w_dst]
        ],
        out_specs=pl.BlockSpec((tile_n, 2), lambda i: (i, 0)),
        out_shape=jax.ShapeDtypeStruct((n_pad, 2), jnp.float32),
        compiler_params=parallel,
    )(adj_bf16, xw, b_enc, w_st)

    # --- K3: edge logits (lane-dense (1, E_pad)) ---
    # TODO(synk): for N >> few thousand, switch the masked-reduce gather to a
    # scalar-prefetch / DMA gather of the (N, 2) score table.
    logits_row = pl.pallas_call(
        _edge_logit_kernel,
        grid=(e_tiles, n_tiles),
        in_specs=[
            pl.BlockSpec((1, tile_e), lambda ei, ni: (0, ei)),   # src ids
            pl.BlockSpec((1, tile_e), lambda ei, ni: (0, ei)),   # dst ids
            pl.BlockSpec((tile_n, 2), lambda ei, ni: (ni, 0)),   # node scores tile
            pl.BlockSpec(memory_space=pltpu.MemorySpace.SMEM),   # b_edge scalar
        ],
        out_specs=pl.BlockSpec((1, tile_e), lambda ei, ni: (0, ei)),
        out_shape=jax.ShapeDtypeStruct((1, e_pad), jnp.float32),
        compiler_params=pltpu.CompilerParams(
            dimension_semantics=("parallel", "arbitrary")
        ),
    )(src, dst, st, b_edge)

    return logits_row[0, :n_edges].reshape(n_edges, 1)


# --------------------------------------------------------------------------
# Params / reference
# --------------------------------------------------------------------------
def make_params(key, feat_dim, emb_dim):
    """Deterministic parameter init matching the module's __init__."""
    k_enc, k_edge = jax.random.split(key)

    bound_enc = math.sqrt(6.0 / (feat_dim + emb_dim))
    w_enc = jax.random.uniform(
        k_enc, (feat_dim, emb_dim), jnp.float32, -bound_enc, bound_enc
    )
    b_enc = jnp.zeros((1, emb_dim), jnp.float32)

    bound_edge = math.sqrt(6.0 / (2 * emb_dim + 1))
    w_edge = jax.random.uniform(
        k_edge, (2 * emb_dim, 1), jnp.float32, -bound_edge, bound_edge
    )
    b_edge = jnp.zeros((1, 1), jnp.float32)

    return {"w_enc": w_enc, "b_enc": b_enc, "w_edge": w_edge, "b_edge": b_edge}


def reference_forward(x, adj, edge_index, params):
    """Pure-JAX f32 reference mirroring the PyTorch module."""
    node_emb = jnp.maximum(adj @ (x @ params["w_enc"]) + params["b_enc"], 0.0)
    emb_src = node_emb[edge_index[0]]
    emb_dst = node_emb[edge_index[1]]
    edge_emb = jnp.concatenate([emb_src, emb_dst], axis=1)
    return edge_emb @ params["w_edge"] + params["b_edge"]


if __name__ == "__main__":
    key = jax.random.PRNGKey(0)
    k_param, k_x, k_adj, k_edges = jax.random.split(key, 4)

    n_nodes, feat_dim, emb_dim, n_edges = 16, 8, 32, 24

    params = make_params(k_param, feat_dim, emb_dim)
    x = jax.random.normal(k_x, (n_nodes, feat_dim), jnp.float32)
    adj = (jax.random.uniform(k_adj, (n_nodes, n_nodes)) < 0.3).astype(jnp.float32)
    adj = jnp.maximum(adj, adj.T)  # symmetric dense adjacency
    edge_index = jax.random.randint(k_edges, (2, n_edges), 0, n_nodes, jnp.int32)

    logits = view_learner_forward(x, adj, edge_index, params)
    jax.block_until_ready(logits)

    ref = reference_forward(x, adj, edge_index, params)
    assert logits.shape == (n_edges, 1)
    # bf16 MXU operands in the adj @ (x @ W) matmul -> loosened tolerance vs f32 ref.
    err = float(jnp.max(jnp.abs(logits - ref)))
    assert jnp.allclose(logits, ref, atol=5e-2, rtol=5e-2), err

    print("KERNEL_OK")
</pallas_src>

<mosaic_0001>
module attributes {stable_mosaic.version = 11 : i64} {
  func.func @_xw_kernel(%arg0: i32, %arg1: memref<16x8xf32, #tpu.memory_space<vmem>>, %arg2: memref<8x32xf32, #tpu.memory_space<vmem>>, %arg3: memref<16x32xf32, #tpu.memory_space<vmem>>) attributes {dimension_semantics = [#tpu.dimension_semantics<parallel>], iteration_bounds = array<i64: 1>, scalar_prefetch = 0 : i64, scratch_operands = 0 : i64, tpu.core_type = #tpu.core_type<tc>, window_params = [{transform_indices = @transform_0, window_bounds = array<i64: 16, 8>}, {pipeline_mode = #tpu.pipeline_mode<synchronous>, transform_indices = @transform_1, window_bounds = array<i64: 8, 32>}, {transform_indices = @transform_2, window_bounds = array<i64: 16, 32>}]} {
    %c0 = arith.constant 0 : index
    %c0_0 = arith.constant 0 : index
    %0 = vector.load %arg1[%c0, %c0_0] : memref<16x8xf32, #tpu.memory_space<vmem>>, vector<16x8xf32>
    %c0_1 = arith.constant 0 : index
    %c0_2 = arith.constant 0 : index
    %1 = vector.load %arg2[%c0_1, %c0_2] : memref<8x32xf32, #tpu.memory_space<vmem>>, vector<8x32xf32>
    %cst = arith.constant dense<0.000000e+00> : vector<16x32xf32>
    %2 = tpu.matmul %0, %1, %cst {dimension_numbers = #tpu.dot_dimension_numbers<[1], [0], [0], [1], [0, 0, 1, 1], [], []>} : vector<16x8xf32>, vector<8x32xf32>, vector<16x32xf32> -> vector<16x32xf32>
    %c0_3 = arith.constant 0 : index
    %c0_4 = arith.constant 0 : index
    %3 = vector.load %arg3[%c0_3, %c0_4] : memref<16x32xf32, #tpu.memory_space<vmem>>, vector<16x32xf32>
    tpu.vector_store %arg3[%c0_3, %c0_4], %2 {strides = array<i32>} : memref<16x32xf32, #tpu.memory_space<vmem>>, vector<16x32xf32>,
    return
  }
  func.func @transform_0(%arg0: i32) -> (i32, i32) {
    %c0_i32 = arith.constant 0 : i32
    %c0_i32_0 = arith.constant 0 : i32
    return %arg0, %c0_i32 : i32, i32
  }
  func.func @transform_1(%arg0: i32) -> (i32, i32) {
    %c0_i32 = arith.constant 0 : i32
    %c0_i32_0 = arith.constant 0 : i32
    %c0_i32_1 = arith.constant 0 : i32
    return %c0_i32, %c0_i32_0 : i32, i32
  }
  func.func @transform_2(%arg0: i32) -> (i32, i32) {
    %c0_i32 = arith.constant 0 : i32
    %c0_i32_0 = arith.constant 0 : i32
    return %arg0, %c0_i32 : i32, i32
  }
}

module attributes {stable_mosaic.version = 11 : i64} {
  func.func @_encoder_scores_kernel(%arg0: i32, %arg1: memref<16x16xbf16, #tpu.memory_space<vmem>>, %arg2: memref<16x32xf32, #tpu.memory_space<vmem>>, %arg3: memref<1x32xf32, #tpu.memory_space<vmem>>, %arg4: memref<32x2xf32, #tpu.memory_space<vmem>>, %arg5: memref<16x2xf32, #tpu.memory_space<vmem>>) attributes {dimension_semantics = [#tpu.dimension_semantics<parallel>], iteration_bounds = array<i64: 1>, scalar_prefetch = 0 : i64, scratch_operands = 0 : i64, tpu.core_type = #tpu.core_type<tc>, window_params = [{transform_indices = @transform_0, window_bounds = array<i64: 16, 16>}, {pipeline_mode = #tpu.pipeline_mode<synchronous>, transform_indices = @transform_1, window_bounds = array<i64: 16, 32>}, {pipeline_mode = #tpu.pipeline_mode<synchronous>, transform_indices = @transform_2, window_bounds = array<i64: 1, 32>}, {pipeline_mode = #tpu.pipeline_mode<synchronous>, transform_indices = @transform_3, window_bounds = array<i64: 32, 2>}, {transform_indices = @transform_4, window_bounds = array<i64: 16, 2>}]} {
    %c0 = arith.constant 0 : index
    %c0_0 = arith.constant 0 : index
    %0 = vector.load %arg1[%c0, %c0_0] : memref<16x16xbf16, #tpu.memory_space<vmem>>, vector<16x16xbf16>
    %c0_1 = arith.constant 0 : index
    %c0_2 = arith.constant 0 : index
    %1 = vector.load %arg2[%c0_1, %c0_2] : memref<16x32xf32, #tpu.memory_space<vmem>>, vector<16x32xf32>
    %2 = arith.truncf %1 : vector<16x32xf32> to vector<16x32xbf16>
    %cst = arith.constant dense<0.000000e+00> : vector<16x32xf32>
    %3 = tpu.matmul %0, %2, %cst {dimension_numbers = #tpu.dot_dimension_numbers<[1], [0], [0], [1], [0, 0, 1, 1], [], []>} : vector<16x16xbf16>, vector<16x32xbf16>, vector<16x32xf32> -> vector<16x32xf32>
    %c0_3 = arith.constant 0 : index
    %c0_4 = arith.constant 0 : index
    %4 = vector.load %arg3[%c0_3, %c0_4] : memref<1x32xf32, #tpu.memory_space<vmem>>, vector<1x32xf32>
    %5 = vector.broadcast %4 : vector<1x32xf32> to vector<16x32xf32>
    %6 = arith.addf %3, %5 : vector<16x32xf32>
    %cst_5 = arith.constant 0.000000e+00 : f32
    %7 = vector.broadcast %cst_5 : f32 to vector<16x32xf32>
    %8 = arith.maximumf %6, %7 : vector<16x32xf32>
    %c0_6 = arith.constant 0 : index
    %c0_7 = arith.constant 0 : index
    %9 = vector.load %arg4[%c0_6, %c0_7] : memref<32x2xf32, #tpu.memory_space<vmem>>, vector<32x2xf32>
    %cst_8 = arith.constant dense<0.000000e+00> : vector<16x2xf32>
    %10 = tpu.matmul %8, %9, %cst_8 {dimension_numbers = #tpu.dot_dimension_numbers<[1], [0], [0], [1], [0, 0, 1, 1], [], []>} : vector<16x32xf32>, vector<32x2xf32>, vector<16x2xf32> -> vector<16x2xf32>
    %c0_9 = arith.constant 0 : index
    %c0_10 = arith.constant 0 : index
    %11 = vector.load %arg5[%c0_9, %c0_10] : memref<16x2xf32, #tpu.memory_space<vmem>>, vector<16x2xf32>
    tpu.vector_store %arg5[%c0_9, %c0_10], %10 {strides = array<i32>} : memref<16x2xf32, #tpu.memory_space<vmem>>, vector<16x2xf32>,
    return
  }
  func.func @transform_0(%arg0: i32) -> (i32, i32) {
    %c0_i32 = arith.constant 0 : i32
    %c0_i32_0 = arith.constant 0 : i32
    return %arg0, %c0_i32 : i32, i32
  }
  func.func @transform_1(%arg0: i32) -> (i32, i32) {
    %c0_i32 = arith.constant 0 : i32
    %c0_i32_0 = arith.constant 0 : i32
    %c0_i32_1 = arith.constant 0 : i32
    return %c0_i32, %c0_i32_0 : i32, i32
  }
  func.func @transform_2(%arg0: i32) -> (i32, i32) {
    %c0_i32 = arith.constant 0 : i32
    %c0_i32_0 = arith.constant 0 : i32
    %c0_i32_1 = arith.constant 0 : i32
    return %c0_i32, %c0_i32_0 : i32, i32
  }
  func.func @transform_3(%arg0: i32) -> (i32, i32) {
    %c0_i32 = arith.constant 0 : i32
    %c0_i32_0 = arith.constant 0 : i32
    %c0_i32_1 = arith.constant 0 : i32
    return %c0_i32, %c0_i32_0 : i32, i32
  }
  func.func @transform_4(%arg0: i32) -> (i32, i32) {
    %c0_i32 = arith.constant 0 : i32
    %c0_i32_0 = arith.constant 0 : i32
    return %arg0, %c0_i32 : i32, i32
  }
}

module attributes {stable_mosaic.version = 11 : i64} {
  func.func @_edge_logit_kernel(%arg0: i32, %arg1: i32, %arg2: memref<1x128xi32, #tpu.memory_space<vmem>>, %arg3: memref<1x128xi32, #tpu.memory_space<vmem>>, %arg4: memref<16x2xf32, #tpu.memory_space<vmem>>, %arg5: memref<1x1xf32, #tpu.memory_space<smem>>, %arg6: memref<1x128xf32, #tpu.memory_space<vmem>>) attributes {dimension_semantics = [#tpu.dimension_semantics<parallel>, #tpu.dimension_semantics<arbitrary>], iteration_bounds = array<i64: 1, 1>, scalar_prefetch = 0 : i64, scratch_operands = 0 : i64, tpu.core_type = #tpu.core_type<tc>, window_params = [{transform_indices = @transform_0, window_bounds = array<i64: 1, 128>}, {transform_indices = @transform_1, window_bounds = array<i64: 1, 128>}, {transform_indices = @transform_2, window_bounds = array<i64: 16, 2>}, {transform_indices = @transform_3, window_bounds = array<i64: 1, 1>}, {transform_indices = @transform_4, window_bounds = array<i64: 1, 128>}]} {
    %c0_i32 = arith.constant 0 : i32
    %0 = arith.cmpi eq, %arg1, %c0_i32 : i32
    %1 = arith.extui %0 : i1 to i32
    %c0_i32_0 = arith.constant 0 : i32
    %2 = arith.cmpi ne, %1, %c0_i32_0 : i32
    scf.if %2 {
      %c0_13 = arith.constant 0 : index
      %c0_14 = arith.constant 0 : index
      %29 = memref.load %arg5[%c0_13, %c0_14] : memref<1x1xf32, #tpu.memory_space<smem>>
      %30 = vector.broadcast %29 : f32 to vector<1x128xf32>
      %c0_15 = arith.constant 0 : index
      %c0_16 = arith.constant 0 : index
      %31 = vector.load %arg6[%c0_15, %c0_16] : memref<1x128xf32, #tpu.memory_space<vmem>>, vector<1x128xf32>
      tpu.vector_store %arg6[%c0_15, %c0_16], %30 {strides = array<i32>} : memref<1x128xf32, #tpu.memory_space<vmem>>, vector<1x128xf32>,
    } else {
    }
    %c16_i32 = arith.constant 16 : i32
    %3 = arith.muli %arg1, %c16_i32 : i32
    %4 = tpu.iota {dimensions = array<i32: 0>} : vector<16x128xi32>
    %5 = vector.broadcast %3 : i32 to vector<16x128xi32>
    %6 = arith.addi %4, %5 : vector<16x128xi32>
    %c0 = arith.constant 0 : index
    %c0_1 = arith.constant 0 : index
    %7 = vector.load %arg4[%c0, %c0_1] : memref<16x2xf32, #tpu.memory_space<vmem>>, vector<16x1xf32>
    %c0_2 = arith.constant 0 : index
    %c1 = arith.constant 1 : index
    %8 = vector.load %arg4[%c0_2, %c1] : memref<16x2xf32, #tpu.memory_space<vmem>>, vector<16x1xf32>
    %c0_3 = arith.constant 0 : index
    %c0_4 = arith.constant 0 : index
    %9 = vector.load %arg2[%c0_3, %c0_4] : memref<1x128xi32, #tpu.memory_space<vmem>>, vector<1x128xi32>
    %10 = vector.broadcast %9 : vector<1x128xi32> to vector<16x128xi32>
    %11 = arith.cmpi eq, %6, %10 : vector<16x128xi32>
    %cst = arith.constant 0.000000e+00 : f32
    %12 = vector.shape_cast %7 : vector<16x1xf32> to vector<16x1xf32>
    %13 = vector.broadcast %12 : vector<16x1xf32> to vector<16x128xf32>
    %14 = vector.broadcast %cst : f32 to vector<16x128xf32>
    %15 = arith.select %11, %13, %14 : vector<16x128xi1>, vector<16x128xf32>
    %c0_5 = arith.constant 0 : index
    %c0_6 = arith.constant 0 : index
    %16 = vector.load %arg3[%c0_5, %c0_6] : memref<1x128xi32, #tpu.memory_space<vmem>>, vector<1x128xi32>
    %17 = vector.broadcast %16 : vector<1x128xi32> to vector<16x128xi32>
    %18 = arith.cmpi eq, %6, %17 : vector<16x128xi32>
    %cst_7 = arith.constant 0.000000e+00 : f32
    %19 = vector.shape_cast %8 : vector<16x1xf32> to vector<16x1xf32>
    %20 = vector.broadcast %19 : vector<16x1xf32> to vector<16x128xf32>
    %21 = vector.broadcast %cst_7 : f32 to vector<16x128xf32>
    %22 = arith.select %18, %20, %21 : vector<16x128xi1>, vector<16x128xf32>
    %23 = arith.addf %15, %22 : vector<16x128xf32>
    %c0_8 = arith.constant 0 : index
    %c0_9 = arith.constant 0 : index
    %24 = vector.load %arg6[%c0_8, %c0_9] : memref<1x128xf32, #tpu.memory_space<vmem>>, vector<1x128xf32>
    %cst_10 = arith.constant dense<0.000000e+00> : vector<128xf32>
    %25 = vector.multi_reduction <add>, %23, %cst_10 [0] : vector<16x128xf32> to vector<128xf32>
    %26 = vector.shape_cast %25 : vector<128xf32> to vector<1x128xf32>
    %27 = arith.addf %24, %26 : vector<1x128xf32>
    %c0_11 = arith.constant 0 : index
    %c0_12 = arith.constant 0 : index
    %28 = vector.load %arg6[%c0_11, %c0_12] : memref<1x128xf32, #tpu.memory_space<vmem>>, vector<1x128xf32>
    tpu.vector_store %arg6[%c0_11, %c0_12], %27 {strides = array<i32>} : memref<1x128xf32, #tpu.memory_space<vmem>>, vector<1x128xf32>,
    return
  }
  func.func @transform_0(%arg0: i32, %arg1: i32) -> (i32, i32) {
    %c0_i32 = arith.constant 0 : i32
    %c0_i32_0 = arith.constant 0 : i32
    return %c0_i32, %arg0 : i32, i32
  }
  func.func @transform_1(%arg0: i32, %arg1: i32) -> (i32, i32) {
    %c0_i32 = arith.constant 0 : i32
    %c0_i32_0 = arith.constant 0 : i32
    return %c0_i32, %arg0 : i32, i32
  }
  func.func @transform_2(%arg0: i32, %arg1: i32) -> (i32, i32) {
    %c0_i32 = arith.constant 0 : i32
    %c0_i32_0 = arith.constant 0 : i32
    return %arg1, %c0_i32 : i32, i32
  }
  func.func @transform_3(%arg0: i32, %arg1: i32) -> (i32, i32) {
    %c0_i32 = arith.constant 0 : i32
    %c0_i32_0 = arith.constant 0 : i32
    %c0_i32_1 = arith.constant 0 : i32
    return %c0_i32, %c0_i32_0 : i32, i32
  }
  func.func @transform_4(%arg0: i32, %arg1: i32) -> (i32, i32) {
    %c0_i32 = arith.constant 0 : i32
    %c0_i32_0 = arith.constant 0 : i32
    return %c0_i32, %arg0 : i32, i32
  }
}

</mosaic_0001>

<bundles_post_ra>
// kernel: view_learner_forward.3
= control target key start
LH: loop header
LB: loop body
LE: loop exit
PB: predicated region body
PF: predicated region fallthrough
CT: control target
= control target key end

     0   :  { %vm14_vm0 = vcmask 64512   ;;  %vm96_vm1 = vcmask 261120   ;;  %s143_s1 = inlined_call_operand.vmem [shape: f32[8,32], index: 1, kind: input, shape index: {}]   ;;  %s144_s0 = inlined_call_operand.vmem [shape: f32[16,8], index: 0, kind: input, shape index: {}]   ;;  %s145_s2 = inlined_call_operand.vmem [shape: f32[16,32], index: 2, kind: output, shape index: {}]  }
   0x1   :  { %v13_v0 = vld [vmem:[%s143_s1] sm:$0xff]  ;;  %v12_v2 = vld [vmem:[%s144_s0 + $0x8] sm:$0xff] }
   0x2   :  { %v11_v1 = vld [vmem:[%s144_s0] sm:$0xff]  ;;  %108 = vmatprep.subr.mxu0 %v13_v0 }
   0x3   :  { %110 = vmatprep.mubr.msk.f32.mxu0 %vm14_vm0, %v11_v1  ;;  %109 = vmatpush3.msra.mxu0 %v13_v0 }
   0x4   :  { %111 = vmatmul.mubr.msk.f32.vlgmr.msra.gmra.mrb[0].mxu0 %vm14_vm0, %v12_v2 }
  0xd7   :  { %v112_v3 = vpop.f32.mrb[0].mxu0 }
  0xd8   :  { %98 = vst.msk [vmem:[%s145_s2 + $0x8] sm:$0xff] %vm96_vm1, %v112_v3  ;;  %v87_v4 = vpop.f32.mrb[1].mxu0 }
  0xd9   :  { %97 = vst.msk [vmem:[%s145_s2] sm:$0xff] %vm96_vm1, %v87_v4 }

// kernel: view_learner_forward.4
= control target key start
LH: loop header
LB: loop body
LE: loop exit
PB: predicated region body
PF: predicated region fallthrough
CT: control target
= control target key end

     0   :  { %v216_v0 = vmov 0.0   ;;  %vm217_vm0 = vmmov 0   ;;  %vm35_vm1 = vcmask 130048   ;;  %vm86_vm2 = vcmask 261120   ;;  %s273_s1 = inlined_call_operand.vmem [shape: f32[16,32], index: 1, kind: input, shape index: {}]   ;;  %s274_s0 = inlined_call_operand.vmem [shape: bf16[16,16], index: 0, kind: input, shape index: {}]   ;;  %s275_s3 = inlined_call_operand.vmem [shape: f32[32,2], index: 3, kind: input, shape index: {}]   ;;  %s276_s2 = inlined_call_operand.vmem [shape: f32[1,32], index: 2, kind: input, shape index: {}]   ;;  %s277_s4 = inlined_call_operand.vmem [shape: f32[16,2], index: 4, kind: output, shape index: {}]  }
   0x1   :  { %188 = vmatprep.subr.bf16.mxu0 %v216_v0  ;;  %v20_v1 = vld [vmem:[%s273_s1] sm:$0xff]  ;;  %v21_v2 = vld [vmem:[%s273_s1 + $0x8] sm:$0xff]  ;;  %190 = vmatprep.mubr.msk.bf16.mxu0 %vm217_vm0, %v216_v0  ;;  %v84_v8 = vld [vmem:[%s275_s3 + $0x10] sm:$0xff]  ;;  %vm168_vm3 = vcmask 15360  }
   0x2   :  { %v22_v3 = vpack.c.bf16 %v21_v2, %v20_v1  ;;  %v82_v4 = vld [vmem:[%s275_s3] sm:$0xff]  ;;  %v83_v6 = vld [vmem:[%s275_s3 + $0x8] sm:$0xff]  ;;  %v85_v9 = vld [vmem:[%s275_s3 + $0x18] sm:$0xff] }
   0x3   :  { %v215_v5 = vld [vmem:[%s274_s0] sm:$0xff]   ;;  %v205_v7 = vpack.c.bf16 %v83_v6, %v82_v4  ;;  %v209_v10 = vpack.c.bf16 %v85_v9, %v84_v8 }
   0x4   :  { %189 = vmatpush3.bf16.msra.mxu0 %v22_v3  ;;  %v175_v11 = vld [vmem:[%s276_s2] ss:$0 sm:$0xff] }
   0x5   :  { %206 = vmatprep.subr.bf16.mxu1 %v205_v7 }
   0x6   :  { %208 = vmatpush3.bf16.msra.mxu1 %v205_v7 }
   0x7   :  { %191 = vmatmul.mubr.msk.bf16.vlgmr.msra.gmra.mrb[0].mxu0 %vm35_vm1, %v215_v5  ;;  %210 = vmatprep.subr.bf16.mxu1 %v209_v10 }
   0xa   :  { %212 = vmatpush3.bf16.msra.mxu1 %v209_v10 }
  0xda   :  { %v73_v12 = vpop.f32.mrb[0].mxu0 }
  0xdb   :  { %v74_v13 = vadd.f32 %v175_v11, %v73_v12  ;;  %v192_v14 = vpop.f32.mrb[1].mxu0 }
  0xdc   :  { %v76_v15 = vpop.f32.mrb[2].mxu0 }
  0xdd   :  { %v80_v16 = vmax.f32 %v74_v13, 0.0  ;;  %v77_v17 = vadd.f32 %v175_v11, %v76_v15  ;;  %v193_v18 = vpop.f32.mrb[3].mxu0 }
  0xdf   :  { %v81_v19 = vmax.f32 %v77_v17, 0.0  ;;  %202 = vmatprep.mubr.msk.f32.mxu1 %vm86_vm2, %v80_v16 }
  0xe1   :  { %203 = vmatmul.mubr.msk.f32.vlgmr.msra.gmra.mrb[0].mxu1 %vm86_vm2, %v81_v19 }
 0x1b4   :  { %v204_v20 = vpop.f32.mrb[0].mxu1 }
 0x1b5   :  { %170 = vst.msk [vmem:[%s277_s4 + $0x8] sm:$0xff] %vm168_vm3, %v204_v20  ;;  %v159_v21 = vpop.f32.mrb[1].mxu1 }
 0x1b6   :  { %169 = vst.msk [vmem:[%s277_s4] sm:$0xff] %vm168_vm3, %v159_v21 }

// kernel: view_learner_forward.5
= control target key start
LH: loop header
LB: loop body
LE: loop exit
PB: predicated region body
PF: predicated region fallthrough
CT: control target
= control target key end

     0   :  { %v93_v0 = vmov 1   ;;  %v94_v1 = vmov 0   ;;  %v26_v5 = vlaneseq  ;;  %s144_s2 = inlined_call_operand.vmem [shape: f32[16,2], index: 2, kind: input, shape index: {}]   ;;  %s145_s3 = inlined_call_operand.<no memory space> [shape: f32[1,1], index: 3, kind: input, shape index: {}]   ;;  %s146_s4 = inlined_call_operand.vmem [shape: f32[1,128], index: 4, kind: output, shape index: {}]   ;;  %s147_s1 = inlined_call_operand.vmem [shape: s32[1,128], index: 1, kind: input, shape index: {}]   ;;  %s148_s0 = inlined_call_operand.vmem [shape: s32[1,128], index: 0, kind: input, shape index: {}]  }
   0x1   :  { %91 = vset.pattern.permute.xlu1 %v93_v0  ;;  %90 = vset.pattern.permute.xlu0 %v94_v1  ;;  %v32_v2 = vld [vmem:[%s144_s2] sm:$0xff]  ;;  %v33_v3 = vld [vmem:[%s144_s2 + $0x8] sm:$0xff]  ;;  %v23_v4 = vstv %s145_s3 }
   0x2   :  { %61 = vperm.xlu1 %91, %v32_v2   ;;  %43 = vperm.xlu0 %90, %v32_v2   ;;  %24 = vst [vmem:[%s146_s4] sm:$0x1] %v23_v4  ;;  %v27_v6 = vshrl.u32 %v26_v5, 7  ;;  %v87_v7 = vld [vmem:[%s147_s1] ss:$0 sm:$0xff] }
   0x3   :  { %v86_v8 = vld [vmem:[%s148_s0] ss:$0 sm:$0xff] }
   0x4   :  { %v28_v9 = vadd.s32 8, %v27_v6  ;;  %vm58_vm0 = vcmp.eq.s32.totalorder %v27_v6, %v87_v7  ;;  %vm39_vm1 = vcmp.eq.s32.totalorder %v27_v6, %v86_v8 }
   0x6   :  { %65 = vperm.xlu1 %91, %v33_v3   ;;  %48 = vperm.xlu0 %90, %v33_v3   ;;  %vm59_vm2 = vcmp.eq.s32.totalorder %v28_v9, %v87_v7  ;;  %vm40_vm3 = vcmp.eq.s32.totalorder %v28_v9, %v86_v8 }
   0x9   :  { %v72_v26 = vld [vmem:[%s146_s4] sm:$0x1] }
   0xa   :  { %92 = vset.pattern.permute.xlu0 %v93_v0 }
  0x81   :  { %v62_v10 = vpop.permute.xlu1 %61  ;;  %v44_v11 = vpop.permute.xlu0 %43 }
  0x82   :  { %v68_v12 = vsel %vm58_vm0, %v62_v10, 0.0  ;;  %v51_v13 = vsel %vm39_vm1, %v44_v11, 0.0 }
  0x83   :  { %v70_v18 = vadd.f32 %v68_v12, %v51_v13 }
  0x85   :  { %v66_v14 = vpop.permute.xlu1 %65  ;;  %v49_v15 = vpop.permute.xlu0 %48 }
  0x86   :  { %v69_v16 = vsel %vm59_vm2, %v66_v14, 0.0  ;;  %v52_v17 = vsel %vm40_vm3, %v49_v15, 0.0 }
  0x87   :  { %v71_v19 = vadd.f32 %v69_v16, %v52_v17 }
  0x89   :  { %v73_v20 = vadd.f32 %v71_v19, %v70_v18 }
  0x8b   :  { %v74_v21 = vrot.slane %v73_v20, 4 }
  0x8d   :  { %v75_v22 = vadd.f32 %v74_v21, %v73_v20 }
  0x8f   :  { %v76_v23 = vrot.slane %v75_v22, 2 }
  0x91   :  { %v77_v24 = vadd.f32 %v76_v23, %v75_v22 }
  0x93   :  { %v78_v25 = vrot.slane %v77_v24, 1 }
  0x95   :  { %v79_v27 = vadd.f32 %v78_v25, %v77_v24 }
  0x97   :  { %v80_v28 = vadd.f32 %v79_v27, %v72_v26 }
  0x99   :  { %81 = vst [vmem:[%s146_s4] sm:$0x1] %v80_v28 }

</bundles_post_ra>
